<compile_context>
chip_gen: v7x
topology: tpu7x:2x2x1
jax: 0.10.0
libtpu: 0.0.40
codegen_flags: <defaults>
</compile_context>

<pallas_src>
import jax
import jax.numpy as jnp
from jax.experimental import pallas as pl
from jax.experimental.pallas import tpu as pltpu


# ----------------------------------------------------------------------------
# DDPM schedules (pure-JAX glue; identical math to the torch version)
# ----------------------------------------------------------------------------
def ddpm_schedules(beta1, beta2, T):
    assert beta1 < beta2 < 1.0
    t = jnp.arange(0, T + 1, dtype=jnp.float32)
    beta_t = (beta2 - beta1) * t / T + beta1
    sqrt_beta_t = jnp.sqrt(beta_t)
    alpha_t = 1.0 - beta_t
    log_alpha_t = jnp.log(alpha_t)
    alphabar_t = jnp.exp(jnp.cumsum(log_alpha_t))
    sqrtab = jnp.sqrt(alphabar_t)
    oneover_sqrta = 1.0 / jnp.sqrt(alpha_t)
    sqrtmab = jnp.sqrt(1.0 - alphabar_t)
    mab_over_sqrtmab = (1.0 - alpha_t) / sqrtmab
    return {
        "alpha_t": alpha_t,
        "oneover_sqrta": oneover_sqrta,
        "sqrt_beta_t": sqrt_beta_t,
        "alphabar_t": alphabar_t,
        "sqrtab": sqrtab,
        "sqrtmab": sqrtmab,
        "mab_over_sqrtmab": mab_over_sqrtmab,
    }


# ----------------------------------------------------------------------------
# Block-size selection
# ----------------------------------------------------------------------------
def _choose_bm(B, C, target_rows=512, max_rows=1024):
    """Images per block.  bm divides B; TM = bm*C is a multiple of 8 whenever
    possible; TM is large (amortize the ~0.35us per-step overhead, fill the
    MXU M dim) but capped for VMEM; prefer >= 2 grid blocks (v7x dual-TC)."""
    divisors = [d for d in range(1, B + 1) if B % d == 0]
    valid = [d for d in divisors if (d * C) % 8 == 0]
    if not valid:
        # no divisor gives an 8-aligned TM (e.g. B=2, C=3): single full block,
        # the kernel zero-pads the ragged rows before the partial-sum reshape.
        return B
    capped = [d for d in valid if d * C <= max_rows] or valid
    multi = [d for d in capped if B // d >= 2]
    pool = multi if multi else capped
    return min(pool, key=lambda d: (abs(d * C - target_rows), -d))


# ----------------------------------------------------------------------------
# Pallas kernel: BM images (TM = BM*C rows) per grid step
# ----------------------------------------------------------------------------
def _ddpm_forward_kernel(rowscal_ref,          # (TM, 2)   f32  [sqrtab, sqrtmab]
                         x_ref,                # (TM, HWp) bf16 streamed
                         noise_ref,            # (TM, HWp) f32  streamed
                         cond_ref,             # (TM, HWp) bf16 streamed cond add-term
                         w_ref,                # (HWp, HWp) bf16 resident
                         out_ref):             # (1, 8, HWp) f32 partial sums
    a = rowscal_ref[:, 0:1]                    # sqrtab[t]  per row
    m = rowscal_ref[:, 1:2]                    # sqrtmab[t] per row

    x = x_ref[...].astype(jnp.float32)
    noise = noise_ref[...]

    # 1) forward diffusion: x_t = sqrtab[_ts] * x + sqrtmab[_ts] * noise
    x_t = a * x + m * noise

    # 2) synthetic eps model: one big MXU matmul + streamed conditioning term
    h = jnp.dot(x_t.astype(jnp.bfloat16), w_ref[...],
                preferred_element_type=jnp.float32)            # (TM, HWp) f32
    eps = jnp.tanh(h + cond_ref[...].astype(jnp.float32))

    # 3) MSE partial sums, kept vectorized (VPU adds only; no cross-lane XLU
    #    reduce, no serial accumulation across the grid)
    dsq = (noise - eps) ** 2                                   # (TM, HWp)
    tm, hw = dsq.shape
    pad_rows = (-tm) % 8
    if pad_rows:  # static fallback for ragged TM (rare); zero rows add nothing
        dsq = jnp.concatenate(
            [dsq, jnp.zeros((pad_rows, hw), dsq.dtype)], axis=0)
    out_ref[0] = dsq.reshape(-1, 8, hw).sum(axis=0)            # (8, HWp)


# ----------------------------------------------------------------------------
# Wrapper (glue: RNG, cond gather, padding, final reduce; heavy compute in-kernel)
# ----------------------------------------------------------------------------
def ddpm_forward_loss(x, c, params, sched, key, n_T, drop_prob=0.1, bm=None):
    """Returns (loss, (ts, noise, context_mask)) — randomness exposed for ref."""
    B, C, H, W = x.shape
    HW = H * W
    HWp = int(pl.cdiv(HW, 128)) * 128          # lane-dense last dim

    k_ts, k_noise, k_mask = jax.random.split(key, 3)
    ts = jax.random.randint(k_ts, (B,), 1, n_T + 1)                 # torch.randint(1, n_T+1)
    noise = jax.random.normal(k_noise, x.shape, dtype=jnp.float32)  # torch.randn_like(x)
    context_mask = jax.random.bernoulli(k_mask, drop_prob, (B,)).astype(jnp.float32)

    if bm is None:
        bm = _choose_bm(B, C)
    assert B % bm == 0
    TM = bm * C
    num_blocks = B // bm

    # per-row diffusion scalars (per image, repeated for each channel row)
    per_img = jnp.stack([sched["sqrtab"][ts], sched["sqrtmab"][ts]], axis=1)
    rowscal = jnp.repeat(per_img, C, axis=0).astype(jnp.float32)    # (B*C, 2)

    # Conditioning add-term.  The class-embedding gather has to be
    # materialized by XLA anyway (perf-review option (a)); fusing the
    # + (t/n_T)*wt + bias terms into the same elementwise pass adds no extra
    # HBM traffic and removes two resident inputs + an in-kernel sublane tile.
    tn = (ts.astype(jnp.float32) / n_T)[:, None, None]
    keep = (1.0 - context_mask)[:, None, None]
    cond = (tn * params["wt"][None]
            + keep * params["emb"][c]
            + params["bias"][None])                                  # (B, C, HW) f32
    cond = cond.reshape(B * C, HW).astype(jnp.bfloat16)

    x_f = x.reshape(B * C, HW).astype(jnp.bfloat16)   # bf16 stream (MXU operand path)
    noise_f = noise.reshape(B * C, HW)                # f32 stream (MSE target)

    def _pad_cols(a):
        p = HWp - a.shape[-1]
        return a if p == 0 else jnp.pad(a, ((0, 0), (0, p)))

    x_f, noise_f, cond = _pad_cols(x_f), _pad_cols(noise_f), _pad_cols(cond)
    Wm = params["W"]
    if HWp != HW:
        Wm = jnp.pad(Wm, ((0, HWp - HW), (0, HWp - HW)))

    # explicit VMEM budget (v7x has 64 MiB physical / 32 MiB default scoped)
    est = 2 * (TM * HWp * 2          # x (bf16, double-buffered)
               + TM * HWp * 4        # noise (f32)
               + TM * HWp * 2        # cond (bf16)
               + TM * 128 * 4        # rowscal (lane-padded)
               + 8 * HWp * 4         # output slab
               + HWp * HWp * 2)      # resident W (bf16)
    vmem_limit = int(min(64 * 1024 * 1024, max(32 * 1024 * 1024, 1.5 * est)))

    partials = pl.pallas_call(
        _ddpm_forward_kernel,
        out_shape=jax.ShapeDtypeStruct((num_blocks, 8, HWp), jnp.float32),
        grid_spec=pltpu.PrefetchScalarGridSpec(
            num_scalar_prefetch=0,
            grid=(num_blocks,),
            in_specs=[
                pl.BlockSpec((TM, 2), lambda blk: (blk, 0)),      # rowscal
                pl.BlockSpec((TM, HWp), lambda blk: (blk, 0)),    # x (bf16)
                pl.BlockSpec((TM, HWp), lambda blk: (blk, 0)),    # noise (f32)
                pl.BlockSpec((TM, HWp), lambda blk: (blk, 0)),    # cond (bf16)
                pl.BlockSpec((HWp, HWp), lambda blk: (0, 0)),     # W (resident bf16)
            ],
            out_specs=pl.BlockSpec((1, 8, HWp), lambda blk: (blk, 0, 0)),
        ),
        compiler_params=pltpu.CompilerParams(
            dimension_semantics=("parallel",),       # shards across TCs on v7x
            vmem_limit_bytes=vmem_limit),
    )(rowscal, x_f, noise_f, cond, Wm)

    loss = jnp.sum(partials) * (1.0 / float(B * C * HW))
    return loss, (ts, noise, context_mask)


# ----------------------------------------------------------------------------
# Pure-JAX reference (same synthetic eps model, same dtype handling)
# ----------------------------------------------------------------------------
def reference_loss(x, c, params, sched, ts, noise, context_mask, n_T):
    B, C, H, W = x.shape
    HW = H * W
    a = sched["sqrtab"][ts][:, None, None]
    m = sched["sqrtmab"][ts][:, None, None]
    # mirror the kernel's bf16 x stream
    x_bf = x.reshape(B, C, HW).astype(jnp.bfloat16).astype(jnp.float32)
    x_t = a * x_bf + m * noise.reshape(B, C, HW)
    h = jnp.einsum("bcp,pq->bcq", x_t.astype(jnp.bfloat16), params["W"],
                   preferred_element_type=jnp.float32)
    tn = (ts.astype(jnp.float32) / n_T)[:, None, None]
    keep = (1.0 - context_mask)[:, None, None]
    cond = (tn * params["wt"][None] + keep * params["emb"][c]
            + params["bias"][None]).astype(jnp.bfloat16).astype(jnp.float32)
    eps = jnp.tanh(h + cond)
    return jnp.mean((noise.reshape(B, C, HW) - eps) ** 2)


# ----------------------------------------------------------------------------
if __name__ == "__main__":
    # small shapes consistent with the module's forward: x NCHW, c class ids
    B, C, H, W = 2, 4, 16, 16
    HW = H * W
    n_T = 400
    betas = (1e-4, 0.02)
    drop_prob = 0.1

    sched = ddpm_schedules(betas[0], betas[1], n_T)

    # deterministic synthetic nn_model parameters (W stored bf16 for the MXU)
    kW, ke, kt = jax.random.split(jax.random.PRNGKey(42), 3)
    params = {
        "W": (jax.random.normal(kW, (HW, HW), jnp.float32)
              / jnp.sqrt(HW)).astype(jnp.bfloat16),
        "emb": jax.random.normal(ke, (10, C, HW), jnp.float32) * 0.1,
        "wt": jax.random.normal(kt, (C, HW), jnp.float32) * 0.1,
        "bias": jnp.zeros((C, HW), jnp.float32),
    }

    # deterministic example inputs
    key = jax.random.PRNGKey(0)
    k_x, k_c, k_fwd = jax.random.split(key, 3)
    x = jax.random.normal(k_x, (B, C, H, W), jnp.float32)
    c = jax.random.randint(k_c, (B,), 0, 10)

    loss, (ts, noise, context_mask) = ddpm_forward_loss(
        x, c, params, sched, k_fwd, n_T, drop_prob)
    loss = jax.block_until_ready(loss)

    ref = jax.block_until_ready(
        reference_loss(x, c, params, sched, ts, noise, context_mask, n_T))

    assert jnp.isfinite(loss), "kernel produced non-finite loss"
    assert jnp.allclose(loss, ref, rtol=5e-2, atol=1e-3), (loss, ref)
    print("KERNEL_OK")
</pallas_src>

<mosaic_0001>
module attributes {stable_mosaic.version = 11 : i64} {
  func.func @_ddpm_forward_kernel(%arg0: i32, %arg1: memref<8x2xf32, #tpu.memory_space<vmem>>, %arg2: memref<8x256xbf16, #tpu.memory_space<vmem>>, %arg3: memref<8x256xf32, #tpu.memory_space<vmem>>, %arg4: memref<8x256xbf16, #tpu.memory_space<vmem>>, %arg5: memref<256x256xbf16, #tpu.memory_space<vmem>>, %arg6: memref<1x8x256xf32, #tpu.memory_space<vmem>>) attributes {dimension_semantics = [#tpu.dimension_semantics<parallel>], iteration_bounds = array<i64: 1>, scalar_prefetch = 0 : i64, scratch_operands = 0 : i64, tpu.core_type = #tpu.core_type<tc>, window_params = [{transform_indices = @transform_0, window_bounds = array<i64: 8, 2>}, {transform_indices = @transform_1, window_bounds = array<i64: 8, 256>}, {transform_indices = @transform_2, window_bounds = array<i64: 8, 256>}, {transform_indices = @transform_3, window_bounds = array<i64: 8, 256>}, {pipeline_mode = #tpu.pipeline_mode<synchronous>, transform_indices = @transform_4, window_bounds = array<i64: 256, 256>}, {transform_indices = @transform_5, window_bounds = array<i64: 1, 8, 256>}]} {
    %c0 = arith.constant 0 : index
    %c0_0 = arith.constant 0 : index
    %0 = vector.load %arg1[%c0, %c0_0] : memref<8x2xf32, #tpu.memory_space<vmem>>, vector<8x1xf32>
    %c0_1 = arith.constant 0 : index
    %c1 = arith.constant 1 : index
    %1 = vector.load %arg1[%c0_1, %c1] : memref<8x2xf32, #tpu.memory_space<vmem>>, vector<8x1xf32>
    %c0_2 = arith.constant 0 : index
    %c0_3 = arith.constant 0 : index
    %2 = vector.load %arg2[%c0_2, %c0_3] : memref<8x256xbf16, #tpu.memory_space<vmem>>, vector<8x256xbf16>
    %3 = arith.extf %2 : vector<8x256xbf16> to vector<8x256xf32>
    %c0_4 = arith.constant 0 : index
    %c0_5 = arith.constant 0 : index
    %4 = vector.load %arg3[%c0_4, %c0_5] : memref<8x256xf32, #tpu.memory_space<vmem>>, vector<8x256xf32>
    %5 = vector.broadcast %0 : vector<8x1xf32> to vector<8x256xf32>
    %6 = arith.mulf %5, %3 : vector<8x256xf32>
    %7 = vector.broadcast %1 : vector<8x1xf32> to vector<8x256xf32>
    %8 = arith.mulf %7, %4 : vector<8x256xf32>
    %9 = arith.addf %6, %8 : vector<8x256xf32>
    %10 = arith.truncf %9 : vector<8x256xf32> to vector<8x256xbf16>
    %c0_6 = arith.constant 0 : index
    %c0_7 = arith.constant 0 : index
    %11 = vector.load %arg5[%c0_6, %c0_7] : memref<256x256xbf16, #tpu.memory_space<vmem>>, vector<256x256xbf16>
    %cst = arith.constant dense<0.000000e+00> : vector<8x256xf32>
    %12 = tpu.matmul %10, %11, %cst {dimension_numbers = #tpu.dot_dimension_numbers<[1], [0], [0], [1], [0, 0, 1, 1], [], []>} : vector<8x256xbf16>, vector<256x256xbf16>, vector<8x256xf32> -> vector<8x256xf32>
    %c0_8 = arith.constant 0 : index
    %c0_9 = arith.constant 0 : index
    %13 = vector.load %arg4[%c0_8, %c0_9] : memref<8x256xbf16, #tpu.memory_space<vmem>>, vector<8x256xbf16>
    %14 = arith.extf %13 : vector<8x256xbf16> to vector<8x256xf32>
    %15 = arith.addf %12, %14 : vector<8x256xf32>
    %16 = math.tanh %15 : vector<8x256xf32>
    %17 = arith.subf %4, %16 : vector<8x256xf32>
    %18 = arith.mulf %17, %17 : vector<8x256xf32>
    %19 = vector.shape_cast %18 : vector<8x256xf32> to vector<1x8x256xf32>
    %cst_10 = arith.constant dense<0.000000e+00> : vector<8x256xf32>
    %20 = vector.multi_reduction <add>, %19, %cst_10 [0] : vector<1x8x256xf32> to vector<8x256xf32>
    %c0_11 = arith.constant 0 : index
    %c0_12 = arith.constant 0 : index
    %c0_13 = arith.constant 0 : index
    %21 = vector.load %arg6[%c0_11, %c0_12, %c0_13] : memref<1x8x256xf32, #tpu.memory_space<vmem>>, vector<1x8x256xf32>
    %22 = vector.shape_cast %21 : vector<1x8x256xf32> to vector<8x256xf32>
    %23 = vector.shape_cast %20 : vector<8x256xf32> to vector<1x8x256xf32>
    tpu.vector_store %arg6[%c0_11, %c0_12, %c0_13], %23 {strides = array<i32>} : memref<1x8x256xf32, #tpu.memory_space<vmem>>, vector<1x8x256xf32>,
    return
  }
  func.func @transform_0(%arg0: i32) -> (i32, i32) {
    %c0_i32 = arith.constant 0 : i32
    %c0_i32_0 = arith.constant 0 : i32
    return %arg0, %c0_i32 : i32, i32
  }
  func.func @transform_1(%arg0: i32) -> (i32, i32) {
    %c0_i32 = arith.constant 0 : i32
    %c0_i32_0 = arith.constant 0 : i32
    return %arg0, %c0_i32 : i32, i32
  }
  func.func @transform_2(%arg0: i32) -> (i32, i32) {
    %c0_i32 = arith.constant 0 : i32
    %c0_i32_0 = arith.constant 0 : i32
    return %arg0, %c0_i32 : i32, i32
  }
  func.func @transform_3(%arg0: i32) -> (i32, i32) {
    %c0_i32 = arith.constant 0 : i32
    %c0_i32_0 = arith.constant 0 : i32
    return %arg0, %c0_i32 : i32, i32
  }
  func.func @transform_4(%arg0: i32) -> (i32, i32) {
    %c0_i32 = arith.constant 0 : i32
    %c0_i32_0 = arith.constant 0 : i32
    %c0_i32_1 = arith.constant 0 : i32
    return %c0_i32, %c0_i32_0 : i32, i32
  }
  func.func @transform_5(%arg0: i32) -> (i32, i32, i32) {
    %c0_i32 = arith.constant 0 : i32
    %c0_i32_0 = arith.constant 0 : i32
    %c0_i32_1 = arith.constant 0 : i32
    return %arg0, %c0_i32, %c0_i32_0 : i32, i32, i32
  }
}

</mosaic_0001>

<bundles_post_ra>
// kernel: tpu_custom_call.1
= control target key start
LH: loop header
LB: loop body
LE: loop exit
PB: predicated region body
PF: predicated region fallthrough
CT: control target
= control target key end

     0   :  { %10 = vsyncpa [#allocation3], 0  ;;  %s626_s0 = inlined_call_operand.vmem [shape: f32[8,2], index: 0, kind: input, shape index: {}]   ;;  %s627_s1 = inlined_call_operand.hbm [shape: bf16[8,256], index: 1, kind: input, shape index: {}]   ;;  %s628_s2 = inlined_call_operand.vmem [shape: f32[8,256], index: 2, kind: input, shape index: {}]   ;;  %s629_s3 = inlined_call_operand.hbm [shape: bf16[8,256], index: 3, kind: input, shape index: {}]   ;;  %s630_s4 = inlined_call_operand.hbm [shape: bf16[256,256], index: 4, kind: input, shape index: {}]   ;;  %s631_s5 = inlined_call_operand.hbm [shape: f32[1,8,256], index: 5, kind: output, shape index: {}]  }
   0x1   :  { %11 = vsyncpa [#allocation6], 0 }
   0x2   :  { %12 = vsyncpa [#allocation4], 0  ;;  %s531_s18 = smov [#allocation5]   ;;  %s532_s20 = smov [#allocation2]  }
   0x3   :  { %s33_s19 = sshll.u32 %s531_s18, 4  ;;  %s21_s21 = sshll.u32 %s532_s20, 4  ;;  %s34_s19 = int_to_ptr.vmem [resolvable:$true] %s33_s19  ;;  %s22_s21 = int_to_ptr.vmem [resolvable:$true] %s21_s21 }
   0x4   :  { %s437_s24 = scalar_lea.hbm %s629_s3, 128 }
   0x5   :  { %p438_p0 = scmp.ne.s32.totalorder %s629_s3, %s437_s24  ;;  %p441_p1 = scmp.lt.u32.totalorder %s437_s24, %s629_s3 }
   0x7   :  { %p443_p2 = pnand %p441_p1, %p438_p0 }
   0x9   :  { %446 = shalt.err (!%p443_p2)
}
   0xa   :  { %s447_s29 = scalar_lea.vmem %s34_s19, 128  ;;  %p452_p4 = scmp.lt.s32.totalorder %s34_s19, %s34_s19 }
   0xb   :  { %p448_p3 = scmp.ne.s32.totalorder %s34_s19, %s447_s29  ;;  %p453_p5 = scmp.lt.s32.totalorder %s447_s29, %s447_s29 }
   0xd   :  { %p454_p6 = por %p453_p5, %p452_p4 }
   0xf   :  { %p455_p7 = pnand %p454_p6, %p448_p3 }
  0x11   :  { %458 = shalt.err (!%p455_p7)
}
  0x12   :  { %36 = dma.hbm_to_vmem [thread:$0]  %s629_s3, 128, %s34_s19, [#allocation6]  }
  0x13   :  { %s459_s9 = scalar_lea.hbm %s627_s1, 128 }
  0x14   :  { %p460_p8 = scmp.ne.s32.totalorder %s627_s1, %s459_s9  ;;  %p463_p9 = scmp.lt.u32.totalorder %s459_s9, %s627_s1 }
  0x16   :  { %p465_p10 = pnand %p463_p9, %p460_p8 }
  0x18   :  { %468 = shalt.err (!%p465_p10)
}
  0x19   :  { %s469_s14 = scalar_lea.vmem %s22_s21, 128  ;;  %p474_p12 = scmp.lt.s32.totalorder %s22_s21, %s22_s21 }
  0x1a   :  { %p470_p11 = scmp.ne.s32.totalorder %s22_s21, %s469_s14  ;;  %p475_p13 = scmp.lt.s32.totalorder %s469_s14, %s469_s14 }
  0x1c   :  { %p476_p0 = por %p475_p13, %p474_p12 }
  0x1e   :  { %p477_p1 = pnand %p476_p0, %p470_p11 }
  0x20   :  { %480 = shalt.err (!%p477_p1)
}
  0x21   :  { %24 = dma.hbm_to_vmem [thread:$0]  %s627_s1, 128, %s22_s21, [#allocation3]  }
  0x22   :  { %s533_s16 = smov [#allocation7]   ;;  %s481_s20 = scalar_lea.hbm %s630_s4, 4096 }
  0x23   :  { %s42_s17 = sshll.u32 %s533_s16, 4  ;;  %p482_p2 = scmp.ne.s32.totalorder %s630_s4, %s481_s20  ;;  %s43_s17 = int_to_ptr.vmem [resolvable:$true] %s42_s17 }
  0x24   :  { %p485_p3 = scmp.lt.u32.totalorder %s481_s20, %s630_s4 }
  0x26   :  { %p487_p4 = pnand %p485_p3, %p482_p2 }
  0x28   :  { %490 = shalt.err (!%p487_p4)
}
  0x29   :  { %s491_s26 = scalar_lea.vmem %s43_s17, 4096  ;;  %p496_p6 = scmp.lt.s32.totalorder %s43_s17, %s43_s17 }
  0x2a   :  { %p492_p5 = scmp.ne.s32.totalorder %s43_s17, %s491_s26  ;;  %p497_p7 = scmp.lt.s32.totalorder %s491_s26, %s491_s26 }
  0x2c   :  { %p498_p8 = por %p497_p7, %p496_p6 }
  0x2e   :  { %p499_p9 = pnand %p498_p8, %p492_p5 }
  0x30   :  { %502 = shalt.err (!%p499_p9)
}
  0x31   :  { %s534_s1 = smov 128   ;;  %s535_s21 = smov 8  }
  0x32   :  { %48 = dma.hbm_to_vmem [thread:$0]  %s630_s4, 4096, %s43_s17, [#allocation6], %s534_s1, %s534_s1, %s535_s21  }
  0x33   :  { %525 = dma.done.wait [#allocation3], 128  }
  0x34   :  { %526 = vsyncadd [#allocation3], 4294967168 }
  0x35   :  { %527 = dma.done.wait [#allocation6], 4224  }
  0x36   :  { %528 = vsyncadd [#allocation6], 4294963072  ;;  %v536_v0 = vmov 0   ;;  %v58_v1 = vld [vmem:[%s626_s0] sm:$0xff]  ;;  %v388_v4 = vld [vmem:[#allocation7 + $0x14] ss:$8 sps:$4 sm:$0xff]  }
  0x37   :  { %383 = vset.pattern.permute.xlu0 %v536_v0  ;;  %v385_v2 = vld [vmem:[#allocation7 + $0x4] ss:$8 sps:$4 sm:$0xff]   ;;  %v387_v3 = vld [vmem:[#allocation7] ss:$8 sps:$4 sm:$0xff]   ;;  %v390_v5 = vld [vmem:[#allocation7 + $0x10] ss:$8 sps:$4 sm:$0xff]  }
  0x38   :  { %66 = vperm.xlu0 %383, %v58_v1   ;;  %276 = vmatprep.subr.bf16.mxu0 %v385_v2  ;;  %v537_v6 = vmov 1   ;;  %v391_v7 = vld [vmem:[#allocation7 + $0x24] ss:$8 sps:$4 sm:$0xff]   ;;  %v393_v8 = vld [vmem:[#allocation7 + $0x20] ss:$8 sps:$4 sm:$0xff]   ;;  %v59_v35 = vld [vmem:[#allocation2] sm:$0xff] }
  0x39   :  { %277 = vmatpush1.bf16.msra.mxu0 %v387_v3  ;;  %v394_v9 = vld [vmem:[#allocation7 + $0x34] ss:$8 sps:$4 sm:$0xff]   ;;  %v396_v10 = vld [vmem:[#allocation7 + $0x30] ss:$8 sps:$4 sm:$0xff]   ;;  %v397_v11 = vld [vmem:[#allocation7 + $0x44] ss:$8 sps:$4 sm:$0xff]   ;;  %v60_v37 = vunpack.c.l.bf16 %v59_v35  ;;  %v61_v38 = vunpack.c.h.bf16 %v59_v35 }
  0x3a   :  { %278 = vmatprep.subr.bf16.mxu0 %v388_v4  ;;  %v399_v12 = vld [vmem:[#allocation7 + $0x40] ss:$8 sps:$4 sm:$0xff]   ;;  %v400_v13 = vld [vmem:[#allocation7 + $0x54] ss:$8 sps:$4 sm:$0xff]   ;;  %v402_v14 = vld [vmem:[#allocation7 + $0x50] ss:$8 sps:$4 sm:$0xff]  }
  0x3b   :  { %v403_v15 = vld [vmem:[#allocation7 + $0x64] ss:$8 sps:$4 sm:$0xff]   ;;  %v405_v16 = vld [vmem:[#allocation7 + $0x60] ss:$8 sps:$4 sm:$0xff]   ;;  %v406_v17 = vld [vmem:[#allocation7 + $0x74] ss:$8 sps:$4 sm:$0xff]  }
  0x3c   :  { %384 = vset.pattern.permute.xlu0 %v537_v6  ;;  %v408_v18 = vld [vmem:[#allocation7 + $0x70] ss:$8 sps:$4 sm:$0xff]   ;;  %v409_v19 = vld [vmem:[#allocation7 + $0x84] ss:$8 sps:$4 sm:$0xff]   ;;  %v411_v20 = vld [vmem:[#allocation7 + $0x80] ss:$8 sps:$4 sm:$0xff]  }
  0x3d   :  { %72 = vperm.xlu0 %384, %v58_v1   ;;  %279 = vmatpush1.bf16.msra.mxu0 %v390_v5  ;;  %v412_v21 = vld [vmem:[#allocation7 + $0x94] ss:$8 sps:$4 sm:$0xff]   ;;  %v414_v22 = vld [vmem:[#allocation7 + $0x90] ss:$8 sps:$4 sm:$0xff]   ;;  %v415_v23 = vld [vmem:[#allocation7 + $0xa4] ss:$8 sps:$4 sm:$0xff]  }
  0x3e   :  { %280 = vmatprep.subr.bf16.mxu0 %v391_v7  ;;  %v417_v24 = vld [vmem:[#allocation7 + $0xa0] ss:$8 sps:$4 sm:$0xff]   ;;  %v418_v25 = vld [vmem:[#allocation7 + $0xb4] ss:$8 sps:$4 sm:$0xff]   ;;  %v420_v26 = vld [vmem:[#allocation7 + $0xb0] ss:$8 sps:$4 sm:$0xff]  }
  0x3f   :  { %v421_v27 = vld [vmem:[#allocation7 + $0xc4] ss:$8 sps:$4 sm:$0xff]   ;;  %v423_v28 = vld [vmem:[#allocation7 + $0xc0] ss:$8 sps:$4 sm:$0xff]   ;;  %v424_v29 = vld [vmem:[#allocation7 + $0xd4] ss:$8 sps:$4 sm:$0xff]  }
  0x40   :  { %v426_v30 = vld [vmem:[#allocation7 + $0xd0] ss:$8 sps:$4 sm:$0xff]   ;;  %v427_v31 = vld [vmem:[#allocation7 + $0xe4] ss:$8 sps:$4 sm:$0xff]   ;;  %v429_v32 = vld [vmem:[#allocation7 + $0xe0] ss:$8 sps:$4 sm:$0xff]  }
  0x41   :  { %281 = vmatpush1.bf16.msra.mxu0 %v393_v8  ;;  %v430_v33 = vld [vmem:[#allocation7 + $0xf4] ss:$8 sps:$4 sm:$0xff]   ;;  %v432_v34 = vld [vmem:[#allocation7 + $0xf0] ss:$8 sps:$4 sm:$0xff]   ;;  %v62_v39 = vld [vmem:[%s628_s2] sm:$0xff] }
  0x42   :  { %282 = vmatprep.subr.bf16.mxu0 %v394_v9  ;;  %v63_v40 = vld [vmem:[%s628_s2 + $0x8] sm:$0xff]  ;;  %v113_v50 = vld [vmem:[#allocation5] sm:$0xff]  ;;  %s538_s2 = smov [#allocation8]  }
  0x43   :  { %v114_v51 = vunpack.c.l.bf16 %v113_v50  ;;  %v115_v52 = vunpack.c.h.bf16 %v113_v50  ;;  %s333_s8 = sshll.u32 %s538_s2, 4  ;;  %s334_s8 = int_to_ptr.vmem [resolvable:$true] %s333_s8 }
  0x44   :  { %s503_s9 = scalar_lea.vmem %s334_s8, 256  ;;  %p508_p11 = scmp.lt.s32.totalorder %s334_s8, %s334_s8 }
  0x45   :  { %283 = vmatpush1.bf16.msra.mxu0 %v396_v10  ;;  %p504_p10 = scmp.ne.s32.totalorder %s334_s8, %s503_s9  ;;  %p509_p12 = scmp.lt.s32.totalorder %s503_s9, %s503_s9 }
  0x46   :  { %284 = vmatprep.subr.bf16.mxu0 %v397_v11 }
  0x47   :  { %p510_p13 = por %p509_p12, %p508_p11 }
  0x49   :  { %285 = vmatpush1.bf16.msra.mxu0 %v399_v12  ;;  %p511_p0 = pnand %p510_p13, %p504_p10 }
  0x4a   :  { %286 = vmatprep.subr.bf16.mxu0 %v400_v13 }
  0x4d   :  { %287 = vmatpush1.bf16.msra.mxu0 %v402_v14 }
  0x4e   :  { %288 = vmatprep.subr.bf16.mxu0 %v403_v15 }
  0x51   :  { %289 = vmatpush1.bf16.msra.mxu0 %v405_v16 }
  0x52   :  { %290 = vmatprep.subr.bf16.mxu0 %v406_v17 }
  0x55   :  { %291 = vmatpush1.bf16.msra.mxu0 %v408_v18 }
  0x56   :  { %292 = vmatprep.subr.bf16.mxu0 %v409_v19 }
  0x59   :  { %293 = vmatpush1.bf16.msra.mxu0 %v411_v20 }
  0x5a   :  { %294 = vmatprep.subr.bf16.mxu0 %v412_v21 }
  0x5d   :  { %295 = vmatpush1.bf16.msra.mxu0 %v414_v22 }
  0x5e   :  { %296 = vmatprep.subr.bf16.mxu0 %v415_v23 }
  0x61   :  { %297 = vmatpush1.bf16.msra.mxu0 %v417_v24 }
  0x62   :  { %298 = vmatprep.subr.bf16.mxu0 %v418_v25 }
  0x65   :  { %299 = vmatpush1.bf16.msra.mxu0 %v420_v26 }
  0x66   :  { %300 = vmatprep.subr.bf16.mxu0 %v421_v27 }
  0x69   :  { %301 = vmatpush1.bf16.msra.mxu0 %v423_v28 }
  0x6a   :  { %302 = vmatprep.subr.bf16.mxu0 %v424_v29 }
  0x6d   :  { %303 = vmatpush1.bf16.msra.mxu0 %v426_v30 }
  0x6e   :  { %304 = vmatprep.subr.bf16.mxu0 %v427_v31 }
  0x71   :  { %305 = vmatpush1.bf16.msra.mxu0 %v429_v32 }
  0x72   :  { %306 = vmatprep.subr.bf16.mxu0 %v430_v33 }
  0x75   :  { %307 = vmatpush1.bf16.msra.mxu0 %v432_v34 }
  0xb7   :  { %v67_v36 = vpop.permute.xlu0 %66 }
  0xb8   :  { %v69_v42 = vmul.f32 %v67_v36, %v60_v37  ;;  %v70_v43 = vmul.f32 %v67_v36, %v61_v38 }
  0xbc   :  { %v73_v41 = vpop.permute.xlu0 %72 }
  0xbd   :  { %v75_v44 = vmul.f32 %v73_v41, %v62_v39  ;;  %v76_v45 = vmul.f32 %v73_v41, %v63_v40 }
  0xbf   :  { %v77_v46 = vadd.f32 %v75_v44, %v69_v42  ;;  %v78_v47 = vadd.f32 %v76_v45, %v70_v43 }
  0xc1   :  { %v79_v48 = vpack.c.bf16 %v77_v46, %v77_v46  ;;  %v80_v49 = vpack.c.bf16 %v78_v47, %v78_v47 }
  0xc3   :  { %308 = vmatprep.mubr.bf16.mxu0 %v80_v49 }
  0xc4   :  { %309 = vmatmul.mubr.bf16.vlgmr.msra.gmra.mrb[0].mxu0 %v79_v48 }
 0x197   :  { %v310_v53 = vpop.f32.mrb[0].mxu0 }
 0x198   :  { %v311_v54 = vadd.f32 %v310_v53, %v114_v51  ;;  %v312_v55 = vpop.f32.mrb[1].mxu0 }
 0x199   :  { %v313_v56 = vadd.f32 %v312_v55, %v115_v52  ;;  %v314_v57 = vpop.f32.mrb[2].mxu0 }
 0x19a   :  { %433 = vtanh.f32 %v311_v54  ;;  %v315_v58 = vpop.f32.mrb[3].mxu0 }
 0x19b   :  { %435 = vtanh.f32 %v313_v56 }
 0x1a4   :  { %v434_v59 = vpop.eup %433 }
 0x1a5   :  { %v436_v60 = vpop.eup %435  ;;  %v319_v61 = vsub.f32 %v62_v39, %v434_v59 }
 0x1a6   :  { %v320_v62 = vsub.f32 %v63_v40, %v436_v60 }
 0x1a7   :  { %v321_v63 = vmul.f32 %v319_v61, %v319_v61 }
 0x1a8   :  { %v322_v0 = vmul.f32 %v320_v62, %v320_v62 }
 0x1a9   :  { %325 = vst [vmem:[#allocation8] sm:$0xff] %v321_v63 }
 0x1aa   :  { %326 = vst [vmem:[#allocation8 + $0x8] sm:$0xff] %v322_v0 }
 0x1ab   :  { %514 = shalt.err (!%p511_p0)
}
 0x1ac   :  { %s515_s12 = scalar_lea.hbm %s631_s5, 256 }
 0x1ad   :  { %p516_p1 = scmp.ne.s32.totalorder %s631_s5, %s515_s12  ;;  %p519_p2 = scmp.lt.u32.totalorder %s515_s12, %s631_s5 }
 0x1af   :  { %p521_p3 = pnand %p519_p2, %p516_p1 }
 0x1b1   :  { %524 = shalt.err (!%p521_p3)
}
 0x1b2   :  { %336 = dma.vmem_to_hbm [thread:$0]  %s334_s8, 256, %s631_s5, [#allocation4]  }
 0x1b3   :  { %529 = dma.done.wait [#allocation4], 256  }
 0x1b4   :  { %530 = vsyncadd [#allocation4], 4294967040 }
 0x1b5   :  { %340 = vsyncpa [#allocation3], 1 }
 0x1b6   :  { %341 = vsyncpa [#allocation6], 1 }
 0x1b7   :  { %342 = vsyncpa [#allocation4], 1 }

</bundles_post_ra>
